<compile_context>
chip_gen: v7x
topology: tpu7x:2x2x1
jax: 0.10.0
libtpu: 0.0.40
codegen_flags: <defaults>
</compile_context>

<pallas_src>
import jax
import jax.numpy as jnp
from jax.experimental import pallas as pl
from jax.experimental.pallas import tpu as pltpu


def _round_up(x, m):
    return (x + m - 1) // m * m


def _mlp_kernel(x_ref, w1_ref, b1_ref, w2_ref, b2_ref, w3_ref, b3_ref, o_ref):
    # One batch tile per grid step; all three matmuls + ReLUs fused in VMEM.
    x = x_ref[...]                                                       # (TB, 6)

    h1 = jnp.dot(x, w1_ref[...], preferred_element_type=jnp.float32)    # (TB, 64)
    h1 = jnp.maximum(h1 + b1_ref[...], 0.0)                             # ReLU

    # TODO(synk): dropout(p=0.5) is identity in eval mode; a training-mode
    # mask would use pltpu.prng_seed / pltpu.prng_random_bits.

    h2 = jnp.dot(h1, w2_ref[...], preferred_element_type=jnp.float32)   # (TB, 32)
    h2 = jnp.maximum(h2 + b2_ref[...], 0.0)                             # ReLU

    out = jnp.dot(h2, w3_ref[...], preferred_element_type=jnp.float32)  # (TB, 3)
    o_ref[...] = (out + b3_ref[...]).astype(o_ref.dtype)


def net_forward(x, params, *, tile_rows=4096):
    """x: (B, 6) float32. params: dict of pre-transposed weights + biases."""
    w1, b1 = params["w1"], params["b1"]     # (6, 64),  (1, 64)
    w2, b2 = params["w2"], params["b2"]     # (64, 32), (1, 32)
    w3, b3 = params["w3"], params["b3"]     # (32, 3),  (1, 3)

    B, K = x.shape
    h1_n, h2_n, n_out = w1.shape[1], w2.shape[1], w3.shape[1]

    # --- batch tiling -----------------------------------------------------
    # When TB < B it must be a sublane multiple (8); when the whole batch fits
    # in one tile, TB == B (block dim == full array dim is always legal).
    tile_rows = max(8, _round_up(tile_rows, 8))
    TB = B if B <= tile_rows else tile_rows
    grid = (pl.cdiv(B, TB),)

    flops = 2 * B * (K * h1_n + h1_n * h2_n + h2_n * n_out)
    bytes_accessed = 4 * (B * (K + n_out)
                          + w1.size + b1.size + w2.size + b2.size
                          + w3.size + b3.size)

    # VMEM budget hint: every f32 row costs 128 lanes * 4 B in VMEM regardless
    # of logical width; x and out are double-buffered, plus headroom for the
    # h1/h2 temporaries and the resident weights.
    lane_row_bytes = 128 * 4
    vmem_est = (4 * TB * lane_row_bytes       # x + out, double-buffered
                + 4 * TB * lane_row_bytes     # h1/h2/out temporaries
                + (1 << 20))                  # weights + misc
    vmem_limit = int(min(max(vmem_est, 32 << 20), 64 << 20))

    return pl.pallas_call(
        _mlp_kernel,
        out_shape=jax.ShapeDtypeStruct((B, n_out), jnp.float32),
        grid_spec=pltpu.PrefetchScalarGridSpec(
            num_scalar_prefetch=0,
            grid=grid,
            in_specs=[
                pl.BlockSpec((TB, K), lambda i: (i, 0)),         # x tile (streamed)
                pl.BlockSpec((K, h1_n), lambda i: (0, 0)),       # w1 (resident)
                pl.BlockSpec((1, h1_n), lambda i: (0, 0)),       # b1
                pl.BlockSpec((h1_n, h2_n), lambda i: (0, 0)),    # w2
                pl.BlockSpec((1, h2_n), lambda i: (0, 0)),       # b2
                pl.BlockSpec((h2_n, n_out), lambda i: (0, 0)),   # w3
                pl.BlockSpec((1, n_out), lambda i: (0, 0)),      # b3
            ],
            out_specs=pl.BlockSpec((TB, n_out), lambda i: (i, 0)),  # (B, 3) direct
        ),
        compiler_params=pltpu.CompilerParams(
            dimension_semantics=("parallel",),       # v7x: split batch over 2 TCs
            vmem_limit_bytes=vmem_limit,
        ),
        cost_estimate=pl.CostEstimate(
            flops=flops, transcendentals=0, bytes_accessed=bytes_accessed),
    )(x, w1, b1, w2, b2, w3, b3)


def init_params(key):
    """Deterministic init matching nn.Linear shapes (uniform +/- 1/sqrt(fan_in))."""
    keys = jax.random.split(key, 6)

    def linear(kw, kb, fan_in, fan_out):
        bound = 1.0 / jnp.sqrt(float(fan_in))
        # PyTorch stores W as (out, in); we pre-transpose to (in, out).
        w = jax.random.uniform(kw, (fan_in, fan_out), jnp.float32, -bound, bound)
        b = jax.random.uniform(kb, (1, fan_out), jnp.float32, -bound, bound)
        return w, b

    w1, b1 = linear(keys[0], keys[1], 6, 64)
    w2, b2 = linear(keys[2], keys[3], 64, 32)
    w3, b3 = linear(keys[4], keys[5], 32, 3)
    return {"w1": w1, "b1": b1, "w2": w2, "b2": b2, "w3": w3, "b3": b3}


def _reference(x, p):
    h1 = jnp.maximum(x @ p["w1"] + p["b1"], 0.0)
    h2 = jnp.maximum(h1 @ p["w2"] + p["b2"], 0.0)
    return h2 @ p["w3"] + p["b3"]


if __name__ == "__main__":
    key = jax.random.PRNGKey(0)
    k_x, k_p = jax.random.split(key)

    params = init_params(k_p)

    # Small batch: single tile, TB == B (full-dim block, no padding anywhere).
    batch = 8
    x = jax.random.normal(k_x, (batch, 6), dtype=jnp.float32)
    out = jax.block_until_ready(net_forward(x, params))
    ref = _reference(x, params)
    assert out.shape == (batch, 3), out.shape
    assert jnp.allclose(out, ref, atol=1e-5, rtol=1e-5), "mismatch vs reference"

    # Larger, non-tile-aligned batch: multi-step grid with a ragged last block.
    big_b = 2500
    xb = jax.random.normal(k_x, (big_b, 6), dtype=jnp.float32)
    outb = jax.block_until_ready(net_forward(xb, params, tile_rows=512))
    refb = _reference(xb, params)
    assert outb.shape == (big_b, 3), outb.shape
    assert jnp.allclose(outb, refb, atol=1e-4, rtol=1e-4), "mismatch (ragged grid)"

    print("KERNEL_OK")
</pallas_src>

<mosaic_0001>
module attributes {stable_mosaic.version = 11 : i64} {
  func.func @_mlp_kernel(%arg0: i32, %arg1: memref<8x6xf32, #tpu.memory_space<vmem>>, %arg2: memref<6x64xf32, #tpu.memory_space<vmem>>, %arg3: memref<1x64xf32, #tpu.memory_space<vmem>>, %arg4: memref<64x32xf32, #tpu.memory_space<vmem>>, %arg5: memref<1x32xf32, #tpu.memory_space<vmem>>, %arg6: memref<32x3xf32, #tpu.memory_space<vmem>>, %arg7: memref<1x3xf32, #tpu.memory_space<vmem>>, %arg8: memref<8x3xf32, #tpu.memory_space<vmem>>) attributes {dimension_semantics = [#tpu.dimension_semantics<parallel>], iteration_bounds = array<i64: 1>, scalar_prefetch = 0 : i64, scratch_operands = 0 : i64, tpu.core_type = #tpu.core_type<tc>, window_params = [{transform_indices = @transform_0, window_bounds = array<i64: 8, 6>}, {pipeline_mode = #tpu.pipeline_mode<synchronous>, transform_indices = @transform_1, window_bounds = array<i64: 6, 64>}, {pipeline_mode = #tpu.pipeline_mode<synchronous>, transform_indices = @transform_2, window_bounds = array<i64: 1, 64>}, {pipeline_mode = #tpu.pipeline_mode<synchronous>, transform_indices = @transform_3, window_bounds = array<i64: 64, 32>}, {pipeline_mode = #tpu.pipeline_mode<synchronous>, transform_indices = @transform_4, window_bounds = array<i64: 1, 32>}, {pipeline_mode = #tpu.pipeline_mode<synchronous>, transform_indices = @transform_5, window_bounds = array<i64: 32, 3>}, {pipeline_mode = #tpu.pipeline_mode<synchronous>, transform_indices = @transform_6, window_bounds = array<i64: 1, 3>}, {transform_indices = @transform_7, window_bounds = array<i64: 8, 3>}]} {
    %c0 = arith.constant 0 : index
    %c0_0 = arith.constant 0 : index
    %0 = vector.load %arg1[%c0, %c0_0] : memref<8x6xf32, #tpu.memory_space<vmem>>, vector<8x6xf32>
    %c0_1 = arith.constant 0 : index
    %c0_2 = arith.constant 0 : index
    %1 = vector.load %arg2[%c0_1, %c0_2] : memref<6x64xf32, #tpu.memory_space<vmem>>, vector<6x64xf32>
    %cst = arith.constant dense<0.000000e+00> : vector<8x64xf32>
    %2 = tpu.matmul %0, %1, %cst {dimension_numbers = #tpu.dot_dimension_numbers<[1], [0], [0], [1], [0, 0, 1, 1], [], []>} : vector<8x6xf32>, vector<6x64xf32>, vector<8x64xf32> -> vector<8x64xf32>
    %c0_3 = arith.constant 0 : index
    %c0_4 = arith.constant 0 : index
    %3 = vector.load %arg3[%c0_3, %c0_4] : memref<1x64xf32, #tpu.memory_space<vmem>>, vector<1x64xf32>
    %4 = vector.broadcast %3 : vector<1x64xf32> to vector<8x64xf32>
    %5 = arith.addf %2, %4 : vector<8x64xf32>
    %cst_5 = arith.constant 0.000000e+00 : f32
    %6 = vector.broadcast %cst_5 : f32 to vector<8x64xf32>
    %7 = arith.maximumf %5, %6 : vector<8x64xf32>
    %c0_6 = arith.constant 0 : index
    %c0_7 = arith.constant 0 : index
    %8 = vector.load %arg4[%c0_6, %c0_7] : memref<64x32xf32, #tpu.memory_space<vmem>>, vector<64x32xf32>
    %cst_8 = arith.constant dense<0.000000e+00> : vector<8x32xf32>
    %9 = tpu.matmul %7, %8, %cst_8 {dimension_numbers = #tpu.dot_dimension_numbers<[1], [0], [0], [1], [0, 0, 1, 1], [], []>} : vector<8x64xf32>, vector<64x32xf32>, vector<8x32xf32> -> vector<8x32xf32>
    %c0_9 = arith.constant 0 : index
    %c0_10 = arith.constant 0 : index
    %10 = vector.load %arg5[%c0_9, %c0_10] : memref<1x32xf32, #tpu.memory_space<vmem>>, vector<1x32xf32>
    %11 = vector.broadcast %10 : vector<1x32xf32> to vector<8x32xf32>
    %12 = arith.addf %9, %11 : vector<8x32xf32>
    %cst_11 = arith.constant 0.000000e+00 : f32
    %13 = vector.broadcast %cst_11 : f32 to vector<8x32xf32>
    %14 = arith.maximumf %12, %13 : vector<8x32xf32>
    %c0_12 = arith.constant 0 : index
    %c0_13 = arith.constant 0 : index
    %15 = vector.load %arg6[%c0_12, %c0_13] : memref<32x3xf32, #tpu.memory_space<vmem>>, vector<32x3xf32>
    %cst_14 = arith.constant dense<0.000000e+00> : vector<8x3xf32>
    %16 = tpu.matmul %14, %15, %cst_14 {dimension_numbers = #tpu.dot_dimension_numbers<[1], [0], [0], [1], [0, 0, 1, 1], [], []>} : vector<8x32xf32>, vector<32x3xf32>, vector<8x3xf32> -> vector<8x3xf32>
    %c0_15 = arith.constant 0 : index
    %c0_16 = arith.constant 0 : index
    %17 = vector.load %arg7[%c0_15, %c0_16] : memref<1x3xf32, #tpu.memory_space<vmem>>, vector<1x3xf32>
    %18 = vector.broadcast %17 : vector<1x3xf32> to vector<8x3xf32>
    %19 = arith.addf %16, %18 : vector<8x3xf32>
    %c0_17 = arith.constant 0 : index
    %c0_18 = arith.constant 0 : index
    %20 = vector.load %arg8[%c0_17, %c0_18] : memref<8x3xf32, #tpu.memory_space<vmem>>, vector<8x3xf32>
    tpu.vector_store %arg8[%c0_17, %c0_18], %19 {strides = array<i32>} : memref<8x3xf32, #tpu.memory_space<vmem>>, vector<8x3xf32>,
    return
  }
  func.func @transform_0(%arg0: i32) -> (i32, i32) {
    %c0_i32 = arith.constant 0 : i32
    %c0_i32_0 = arith.constant 0 : i32
    return %arg0, %c0_i32 : i32, i32
  }
  func.func @transform_1(%arg0: i32) -> (i32, i32) {
    %c0_i32 = arith.constant 0 : i32
    %c0_i32_0 = arith.constant 0 : i32
    %c0_i32_1 = arith.constant 0 : i32
    return %c0_i32, %c0_i32_0 : i32, i32
  }
  func.func @transform_2(%arg0: i32) -> (i32, i32) {
    %c0_i32 = arith.constant 0 : i32
    %c0_i32_0 = arith.constant 0 : i32
    %c0_i32_1 = arith.constant 0 : i32
    return %c0_i32, %c0_i32_0 : i32, i32
  }
  func.func @transform_3(%arg0: i32) -> (i32, i32) {
    %c0_i32 = arith.constant 0 : i32
    %c0_i32_0 = arith.constant 0 : i32
    %c0_i32_1 = arith.constant 0 : i32
    return %c0_i32, %c0_i32_0 : i32, i32
  }
  func.func @transform_4(%arg0: i32) -> (i32, i32) {
    %c0_i32 = arith.constant 0 : i32
    %c0_i32_0 = arith.constant 0 : i32
    %c0_i32_1 = arith.constant 0 : i32
    return %c0_i32, %c0_i32_0 : i32, i32
  }
  func.func @transform_5(%arg0: i32) -> (i32, i32) {
    %c0_i32 = arith.constant 0 : i32
    %c0_i32_0 = arith.constant 0 : i32
    %c0_i32_1 = arith.constant 0 : i32
    return %c0_i32, %c0_i32_0 : i32, i32
  }
  func.func @transform_6(%arg0: i32) -> (i32, i32) {
    %c0_i32 = arith.constant 0 : i32
    %c0_i32_0 = arith.constant 0 : i32
    %c0_i32_1 = arith.constant 0 : i32
    return %c0_i32, %c0_i32_0 : i32, i32
  }
  func.func @transform_7(%arg0: i32) -> (i32, i32) {
    %c0_i32 = arith.constant 0 : i32
    %c0_i32_0 = arith.constant 0 : i32
    return %arg0, %c0_i32 : i32, i32
  }
}

</mosaic_0001>

<bundles_post_ra>
// kernel: tpu_custom_call.1
= control target key start
LH: loop header
LB: loop body
LE: loop exit
PB: predicated region body
PF: predicated region fallthrough
CT: control target
= control target key end

     0   :  { %vm39_vm0 = vcmask 1045504   ;;  %vm35_vm1 = vcmask 48128   ;;  %v374_v0 = vmov 0.0   ;;  %vm375_vm2 = vmmov 0   ;;  %s471_s1 = inlined_call_operand.vmem [shape: f32[6,64], index: 1, kind: input, shape index: {}]   ;;  %s472_s0 = inlined_call_operand.vmem [shape: f32[8,6], index: 0, kind: input, shape index: {}]   ;;  %s473_s3 = inlined_call_operand.vmem [shape: f32[64,32], index: 3, kind: input, shape index: {}]   ;;  %s474_s5 = inlined_call_operand.vmem [shape: f32[32,3], index: 5, kind: input, shape index: {}]   ;;  %s475_s2 = inlined_call_operand.vmem [shape: f32[1,64], index: 2, kind: input, shape index: {}]   ;;  %s476_s4 = inlined_call_operand.vmem [shape: f32[1,32], index: 4, kind: input, shape index: {}]   ;;  %s477_s6 = inlined_call_operand.vmem [shape: f32[1,3], index: 6, kind: input, shape index: {}]   ;;  %s478_s7 = inlined_call_operand.vmem [shape: f32[8,3], index: 7, kind: output, shape index: {}]  }
   0x1   :  { %318 = vmatprep.subr.mxu0 %v374_v0  ;;  %v27_v1 = vld [vmem:[%s471_s1] sm:$0x3f]  ;;  %320 = vmatprep.mubr.msk.f32.mxu0 %vm375_vm2, %v374_v0  ;;  %v376_v4 = vmov 0.0|0.0   ;;  %v115_v5 = vld [vmem:[%s473_s3 + $0x8] sm:$0xff]  ;;  %v116_v6 = vld [vmem:[%s473_s3 + $0x10] sm:$0xff]  ;;  %vm129_vm3 = vcmask 523264  }
   0x2   :  { %v26_v2 = vld [vmem:[%s472_s0] sm:$0xff]  ;;  %319 = vmatpush3.msk.msra.mxu0 %vm39_vm0, %v27_v1  ;;  %353 = vmatprep.subr.bf16.mxu1 %v376_v4  ;;  %v117_v7 = vld [vmem:[%s473_s3 + $0x18] sm:$0xff]  ;;  %v119_v11 = vld [vmem:[%s473_s3 + $0x28] sm:$0xff]  ;;  %vm215_vm4 = vcmask 261120   ;;  %vm289_vm5 = vcmask 23552  }
   0x3   :  { %v114_v3 = vld [vmem:[%s473_s3] sm:$0xff]  ;;  %321 = vmatmul.mubr.msk.f32.vlgmr.msra.gmra.mrb[0].mxu0 %vm35_vm1, %v26_v2  ;;  %339 = vmatprep.mubr.msk.f32.mxu1 %vm375_vm2, %v374_v0  ;;  %v357_v9 = vpack.c.bf16 %v117_v7, %v116_v6  ;;  %v120_v13 = vld [vmem:[%s473_s3 + $0x30] sm:$0xff]  ;;  %v121_v14 = vld [vmem:[%s473_s3 + $0x38] sm:$0xff] }
   0x4   :  { %v354_v8 = vpack.c.bf16 %v115_v5, %v114_v3  ;;  %365 = vmatprep.subr.bf16.mxu0 %v376_v4  ;;  %350 = vmatprep.mubr.msk.f32.mxu0 %vm375_vm2, %v374_v0  ;;  %v118_v10 = vld [vmem:[%s473_s3 + $0x20] sm:$0xff]  ;;  %v363_v15 = vpack.c.bf16 %v121_v14, %v120_v13  ;;  %v205_v17 = vld [vmem:[%s474_s5 + $0x8] sm:$0xff]  ;;  %v206_v24 = vld [vmem:[%s474_s5 + $0x10] sm:$0xff] }
   0x5   :  { %v360_v12 = vpack.c.bf16 %v119_v11, %v118_v10  ;;  %v204_v16 = vld [vmem:[%s474_s5] sm:$0xff]  ;;  %v207_v25 = vld [vmem:[%s474_s5 + $0x18] sm:$0xff] }
   0x6   :  { %355 = vmatpush3.bf16.msra.mxu1 %v354_v8  ;;  %v366_v18 = vpack.c.bf16 %v205_v17, %v204_v16  ;;  %v295_v19 = vld [vmem:[%s475_s2] ss:$0 sm:$0xff]  ;;  %v369_v26 = vpack.c.bf16 %v207_v25, %v206_v24 }
   0x7   :  { %356 = vmatprep.subr.bf16.mxu1 %v376_v4  ;;  %v298_v27 = vld [vmem:[%s476_s4] ss:$0 sm:$0xff] }
   0x8   :  { %367 = vmatpush3.bf16.msra.mxu0 %v366_v18  ;;  %v300_v32 = vld [vmem:[%s477_s6] ss:$0 sm:$0xff] }
   0x9   :  { %368 = vmatprep.subr.bf16.mxu0 %v376_v4 }
   0xa   :  { %358 = vmatpush3.bf16.msra.mxu1 %v357_v9 }
   0xb   :  { %359 = vmatprep.subr.bf16.mxu1 %v376_v4 }
   0xc   :  { %370 = vmatpush3.bf16.msra.mxu0 %v369_v26 }
   0xe   :  { %361 = vmatpush3.bf16.msra.mxu1 %v360_v12 }
   0xf   :  { %362 = vmatprep.subr.bf16.mxu1 %v376_v4 }
  0x12   :  { %364 = vmatpush3.bf16.msra.mxu1 %v363_v15 }
  0xd6   :  { %v109_v20 = vpop.f32.mrb[0].mxu0 }
  0xd7   :  { %v110_v21 = vadd.f32 %v295_v19, %v109_v20  ;;  %v322_v22 = vpop.f32.mrb[1].mxu0 }
  0xd9   :  { %v113_v23 = vmax.f32 %v110_v21, 0.0 }
  0xdb   :  { %340 = vmatmul.mubr.msk.f32.vlgmr.msra.gmra.mrb[0].mxu1 %vm129_vm3, %v113_v23 }
 0x1ae   :  { %v199_v28 = vpop.f32.mrb[0].mxu1 }
 0x1af   :  { %v200_v29 = vadd.f32 %v298_v27, %v199_v28  ;;  %v341_v30 = vpop.f32.mrb[1].mxu1 }
 0x1b1   :  { %v203_v31 = vmax.f32 %v200_v29, 0.0 }
 0x1b3   :  { %351 = vmatmul.mubr.msk.f32.vlgmr.msra.gmra.mrb[2].mxu0 %vm215_vm4, %v203_v31 }
 0x286   :  { %v285_v33 = vpop.f32.mrb[2].mxu0 }
 0x287   :  { %v286_v34 = vadd.f32 %v300_v32, %v285_v33  ;;  %v352_v35 = vpop.f32.mrb[3].mxu0 }
 0x289   :  { %290 = vst.msk [vmem:[%s478_s7] sm:$0xff] %vm289_vm5, %v286_v34 }

</bundles_post_ra>
